<compile_context>
chip_gen: v7x
topology: tpu7x:2x2x1
jax: 0.10.0
libtpu: 0.0.40
codegen_flags: <defaults>
</compile_context>

<pallas_src>
import functools
import math

import jax
import jax.numpy as jnp
from jax import lax
from jax.experimental import pallas as pl
from jax.experimental.pallas import tpu as pltpu


def _round_up(n, m):
    return ((n + m - 1) // m) * m


_TILE_CAP = 8192  # review: sweep 8192-32768; 8192 keeps f32 intermediates (~5 MiB
                  # incl. double-buffered x tile) far under default scoped VMEM.


def _choose_tile_b(B):
    single = _round_up(max(B, 1), 128)
    if single <= 256:
        # Tiny batches: one lane-aligned tile.
        return single
    # Large batches: big tiles to amortize per-step overhead, but keep >=2 grid
    # steps so v7x's two TensorCores both get work on the "parallel" batch axis.
    half = _round_up((B + 1) // 2, 128)
    return max(128, min(_TILE_CAP, half))


def mlp_kernel(x_ref, w1_ref, b1_ref, w2_ref, b2_ref, w3_ref, b3_ref, o_ref):
    """Fused 3-layer MLP on one batch tile.

    x_ref : (tile_b, d_in) f32   -- natural layout straight from HBM
    wN_ref: (out, in)      f32   -- torch nn.Linear weight layout, VMEM-resident
    bN_ref: (out, 1)       f32   -- bias column, lane-broadcast
    o_ref : (1, tile_b)    f32   -- sigmoid(fc3), lane-dense store (batch on lanes)
    """
    x = x_ref[...]

    # fc1 + ReLU: contract x's feature axis -> (32, tile_b), batch on lanes.
    h1 = lax.dot_general(
        w1_ref[...], x,
        dimension_numbers=(((1,), (1,)), ((), ())),
        preferred_element_type=jnp.float32,
    ) + b1_ref[...]
    h1 = jnp.maximum(h1, 0.0)

    # fc2 + ReLU: (64, 32) @ (32, tile_b) -> (64, tile_b)
    h2 = jnp.dot(w2_ref[...], h1, preferred_element_type=jnp.float32) + b2_ref[...]
    h2 = jnp.maximum(h2, 0.0)

    # fc3 + Sigmoid: (1, 64) @ (64, tile_b) -> (1, tile_b)
    logits = jnp.dot(w3_ref[...], h2, preferred_element_type=jnp.float32) + b3_ref[...]
    o_ref[...] = jax.nn.sigmoid(logits)


@functools.partial(jax.jit, static_argnames=("tile_b", "small_batch_threshold"))
def net_forward(x, params, tile_b=None, small_batch_threshold=0):
    """Forward pass matching torch Net: x is (B, input_shape) f32, returns (B, 1) f32.

    small_batch_threshold: batches smaller than this take the plain-XLA path
    (pure launch-overhead regime).  Default 0 => always use the Pallas kernel.
    Production code would typically set this to ~512-1024.
    """
    w1, b1, w2, b2, w3, b3 = params  # torch layout: w (out, in), b (out,)
    B, d_in = x.shape

    if B < small_batch_threshold:
        return reference_forward_f32(x, params)

    if tile_b is None:
        tile_b = _choose_tile_b(B)
    tile_b = max(128, _round_up(tile_b, 128))  # lane-width / MXU-N aligned

    x = x.astype(jnp.float32)
    w1f = w1.astype(jnp.float32)
    w2f = w2.astype(jnp.float32)
    w3f = w3.astype(jnp.float32)
    b1c = b1.astype(jnp.float32).reshape(-1, 1)
    b2c = b2.astype(jnp.float32).reshape(-1, 1)
    b3c = b3.astype(jnp.float32).reshape(-1, 1)

    num_tiles = pl.cdiv(B, tile_b)
    out_cols = num_tiles * tile_b  # padded output slab; input is NOT padded/copied

    out_t = pl.pallas_call(
        mlp_kernel,
        out_shape=jax.ShapeDtypeStruct((1, out_cols), jnp.float32),
        grid=(num_tiles,),
        in_specs=[
            # activations: tiled along batch, natural (B, d_in) layout; the last
            # (possibly partial) tile is handled by Pallas block masking.
            pl.BlockSpec((tile_b, d_in), lambda i: (i, 0)),
            # weights / biases: full-extent blocks, constant index_map -> resident
            pl.BlockSpec(w1f.shape, lambda i: (0, 0)),
            pl.BlockSpec(b1c.shape, lambda i: (0, 0)),
            pl.BlockSpec(w2f.shape, lambda i: (0, 0)),
            pl.BlockSpec(b2c.shape, lambda i: (0, 0)),
            pl.BlockSpec(w3f.shape, lambda i: (0, 0)),
            pl.BlockSpec(b3c.shape, lambda i: (0, 0)),
        ],
        out_specs=pl.BlockSpec((1, tile_b), lambda i: (0, i)),
        compiler_params=pltpu.CompilerParams(
            dimension_semantics=("parallel",),  # megacore sharding on v7x
        ),
    )(x, w1f, b1c, w2f, b2c, w3f, b3c)

    # back to torch-style (B, 1) f32 (transpose of a (1, B) slab == reshape)
    return out_t[:, :B].reshape(B, 1)


def init_params(key, input_shape):
    """Deterministic init mimicking torch.nn.Linear defaults, in torch layout."""

    def linear(key, fan_in, fan_out):
        kw, kb = jax.random.split(key)
        bound = 1.0 / math.sqrt(fan_in)
        w = jax.random.uniform(kw, (fan_out, fan_in), jnp.float32, -bound, bound)
        b = jax.random.uniform(kb, (fan_out,), jnp.float32, -bound, bound)
        return w, b

    k1, k2, k3 = jax.random.split(key, 3)
    w1, b1 = linear(k1, input_shape, 32)
    w2, b2 = linear(k2, 32, 64)
    w3, b3 = linear(k3, 64, 1)
    return (w1, b1, w2, b2, w3, b3)


def reference_forward_f32(x, params):
    """Pure-f32 reference (exact torch semantics)."""
    w1, b1, w2, b2, w3, b3 = params
    h1 = jnp.maximum(x @ w1.T + b1, 0.0)
    h2 = jnp.maximum(h1 @ w2.T + b2, 0.0)
    return jax.nn.sigmoid(h2 @ w3.T + b3)


if __name__ == "__main__":
    key = jax.random.PRNGKey(0)
    k_params, k_x1, k_x2 = jax.random.split(key, 3)

    input_shape = 16  # small observation vector
    params = init_params(k_params, input_shape)

    # Small-shape check (B=2): single grid step, partial 128-wide tile (no pad copy).
    x_small = jax.random.normal(k_x1, (2, input_shape), jnp.float32)
    out_small = jax.block_until_ready(net_forward(x_small, params))
    assert out_small.shape == (2, 1)
    assert jnp.allclose(out_small, reference_forward_f32(x_small, params),
                        atol=2e-3, rtol=2e-3)

    # Multi-tile check: exercises the batch grid (>=2 tiles), the partial last
    # tile, and VMEM-resident weights.
    x_big = jax.random.normal(k_x2, (300, input_shape), jnp.float32)
    out_big = jax.block_until_ready(net_forward(x_big, params))
    assert out_big.shape == (300, 1)
    assert jnp.allclose(out_big, reference_forward_f32(x_big, params),
                        atol=2e-3, rtol=2e-3)

    print("KERNEL_OK")
</pallas_src>

<mosaic_0001>
module attributes {stable_mosaic.version = 11 : i64} {
  func.func @mlp_kernel(%arg0: i32, %arg1: memref<128x16xf32, #tpu.memory_space<vmem>>, %arg2: memref<32x16xf32, #tpu.memory_space<vmem>>, %arg3: memref<32x1xf32, #tpu.memory_space<vmem>>, %arg4: memref<64x32xf32, #tpu.memory_space<vmem>>, %arg5: memref<64x1xf32, #tpu.memory_space<vmem>>, %arg6: memref<1x64xf32, #tpu.memory_space<vmem>>, %arg7: memref<1x1xf32, #tpu.memory_space<vmem>>, %arg8: memref<1x128xf32, #tpu.memory_space<vmem>>) attributes {dimension_semantics = [#tpu.dimension_semantics<parallel>], iteration_bounds = array<i64: 1>, scalar_prefetch = 0 : i64, scratch_operands = 0 : i64, tpu.core_type = #tpu.core_type<tc>, window_params = [{transform_indices = @transform_0, window_bounds = array<i64: 128, 16>}, {pipeline_mode = #tpu.pipeline_mode<synchronous>, transform_indices = @transform_1, window_bounds = array<i64: 32, 16>}, {pipeline_mode = #tpu.pipeline_mode<synchronous>, transform_indices = @transform_2, window_bounds = array<i64: 32, 1>}, {pipeline_mode = #tpu.pipeline_mode<synchronous>, transform_indices = @transform_3, window_bounds = array<i64: 64, 32>}, {pipeline_mode = #tpu.pipeline_mode<synchronous>, transform_indices = @transform_4, window_bounds = array<i64: 64, 1>}, {pipeline_mode = #tpu.pipeline_mode<synchronous>, transform_indices = @transform_5, window_bounds = array<i64: 1, 64>}, {pipeline_mode = #tpu.pipeline_mode<synchronous>, transform_indices = @transform_6, window_bounds = array<i64: 1, 1>}, {transform_indices = @transform_7, window_bounds = array<i64: 1, 128>}]} {
    %c0 = arith.constant 0 : index
    %c0_0 = arith.constant 0 : index
    %0 = vector.load %arg1[%c0, %c0_0] : memref<128x16xf32, #tpu.memory_space<vmem>>, vector<128x16xf32>
    %c0_1 = arith.constant 0 : index
    %c0_2 = arith.constant 0 : index
    %1 = vector.load %arg2[%c0_1, %c0_2] : memref<32x16xf32, #tpu.memory_space<vmem>>, vector<32x16xf32>
    %cst = arith.constant dense<0.000000e+00> : vector<32x128xf32>
    %2 = tpu.matmul %1, %0, %cst {dimension_numbers = #tpu.dot_dimension_numbers<[1], [1], [0], [0], [0, 0, 1, 0], [], []>} : vector<32x16xf32>, vector<128x16xf32>, vector<32x128xf32> -> vector<32x128xf32>
    %c0_3 = arith.constant 0 : index
    %c0_4 = arith.constant 0 : index
    %3 = vector.load %arg3[%c0_3, %c0_4] : memref<32x1xf32, #tpu.memory_space<vmem>>, vector<32x1xf32>
    %4 = vector.broadcast %3 : vector<32x1xf32> to vector<32x128xf32>
    %5 = arith.addf %2, %4 : vector<32x128xf32>
    %cst_5 = arith.constant 0.000000e+00 : f32
    %6 = vector.broadcast %cst_5 : f32 to vector<32x128xf32>
    %7 = arith.maximumf %5, %6 : vector<32x128xf32>
    %c0_6 = arith.constant 0 : index
    %c0_7 = arith.constant 0 : index
    %8 = vector.load %arg4[%c0_6, %c0_7] : memref<64x32xf32, #tpu.memory_space<vmem>>, vector<64x32xf32>
    %cst_8 = arith.constant dense<0.000000e+00> : vector<64x128xf32>
    %9 = tpu.matmul %8, %7, %cst_8 {dimension_numbers = #tpu.dot_dimension_numbers<[1], [0], [0], [1], [0, 0, 1, 1], [], []>} : vector<64x32xf32>, vector<32x128xf32>, vector<64x128xf32> -> vector<64x128xf32>
    %c0_9 = arith.constant 0 : index
    %c0_10 = arith.constant 0 : index
    %10 = vector.load %arg5[%c0_9, %c0_10] : memref<64x1xf32, #tpu.memory_space<vmem>>, vector<64x1xf32>
    %11 = vector.broadcast %10 : vector<64x1xf32> to vector<64x128xf32>
    %12 = arith.addf %9, %11 : vector<64x128xf32>
    %cst_11 = arith.constant 0.000000e+00 : f32
    %13 = vector.broadcast %cst_11 : f32 to vector<64x128xf32>
    %14 = arith.maximumf %12, %13 : vector<64x128xf32>
    %c0_12 = arith.constant 0 : index
    %c0_13 = arith.constant 0 : index
    %15 = vector.load %arg6[%c0_12, %c0_13] : memref<1x64xf32, #tpu.memory_space<vmem>>, vector<1x64xf32>
    %cst_14 = arith.constant dense<0.000000e+00> : vector<1x128xf32>
    %16 = tpu.matmul %15, %14, %cst_14 {dimension_numbers = #tpu.dot_dimension_numbers<[1], [0], [0], [1], [0, 0, 1, 1], [], []>} : vector<1x64xf32>, vector<64x128xf32>, vector<1x128xf32> -> vector<1x128xf32>
    %c0_15 = arith.constant 0 : index
    %c0_16 = arith.constant 0 : index
    %17 = vector.load %arg7[%c0_15, %c0_16] : memref<1x1xf32, #tpu.memory_space<vmem>>, vector<1x1xf32>
    %18 = vector.broadcast %17 : vector<1x1xf32> to vector<1x128xf32>
    %19 = arith.addf %16, %18 : vector<1x128xf32>
    %20 = arith.negf %19 : vector<1x128xf32>
    %21 = math.exp %20 : vector<1x128xf32>
    %cst_17 = arith.constant 1.000000e+00 : f32
    %22 = vector.broadcast %cst_17 : f32 to vector<1x128xf32>
    %23 = arith.addf %22, %21 : vector<1x128xf32>
    %24 = arith.divf %22, %23 : vector<1x128xf32>
    %c0_18 = arith.constant 0 : index
    %c0_19 = arith.constant 0 : index
    %25 = vector.load %arg8[%c0_18, %c0_19] : memref<1x128xf32, #tpu.memory_space<vmem>>, vector<1x128xf32>
    tpu.vector_store %arg8[%c0_18, %c0_19], %24 {strides = array<i32>} : memref<1x128xf32, #tpu.memory_space<vmem>>, vector<1x128xf32>,
    return
  }
  func.func @transform_0(%arg0: i32) -> (i32, i32) {
    %c0_i32 = arith.constant 0 : i32
    %c0_i32_0 = arith.constant 0 : i32
    return %arg0, %c0_i32 : i32, i32
  }
  func.func @transform_1(%arg0: i32) -> (i32, i32) {
    %c0_i32 = arith.constant 0 : i32
    %c0_i32_0 = arith.constant 0 : i32
    %c0_i32_1 = arith.constant 0 : i32
    return %c0_i32, %c0_i32_0 : i32, i32
  }
  func.func @transform_2(%arg0: i32) -> (i32, i32) {
    %c0_i32 = arith.constant 0 : i32
    %c0_i32_0 = arith.constant 0 : i32
    %c0_i32_1 = arith.constant 0 : i32
    return %c0_i32, %c0_i32_0 : i32, i32
  }
  func.func @transform_3(%arg0: i32) -> (i32, i32) {
    %c0_i32 = arith.constant 0 : i32
    %c0_i32_0 = arith.constant 0 : i32
    %c0_i32_1 = arith.constant 0 : i32
    return %c0_i32, %c0_i32_0 : i32, i32
  }
  func.func @transform_4(%arg0: i32) -> (i32, i32) {
    %c0_i32 = arith.constant 0 : i32
    %c0_i32_0 = arith.constant 0 : i32
    %c0_i32_1 = arith.constant 0 : i32
    return %c0_i32, %c0_i32_0 : i32, i32
  }
  func.func @transform_5(%arg0: i32) -> (i32, i32) {
    %c0_i32 = arith.constant 0 : i32
    %c0_i32_0 = arith.constant 0 : i32
    %c0_i32_1 = arith.constant 0 : i32
    return %c0_i32, %c0_i32_0 : i32, i32
  }
  func.func @transform_6(%arg0: i32) -> (i32, i32) {
    %c0_i32 = arith.constant 0 : i32
    %c0_i32_0 = arith.constant 0 : i32
    %c0_i32_1 = arith.constant 0 : i32
    return %c0_i32, %c0_i32_0 : i32, i32
  }
  func.func @transform_7(%arg0: i32) -> (i32, i32) {
    %c0_i32 = arith.constant 0 : i32
    %c0_i32_0 = arith.constant 0 : i32
    return %c0_i32, %arg0 : i32, i32
  }
}

</mosaic_0001>

<bundles_post_ra>
// kernel: net_forward.1
= control target key start
LH: loop header
LB: loop body
LE: loop exit
PB: predicated region body
PF: predicated region fallthrough
CT: control target
= control target key end

     0   :  { %vm72_vm0 = vcmask 130048   ;;  %v738_v3 = vmov 0   ;;  %vm278_vm2 = vcmask 261120   ;;  %vm740_vm3 = vmmov 0   ;;  %s961_s0 = inlined_call_operand.vmem [shape: f32[2,16], index: 0, kind: input, shape index: {}]   ;;  %s962_s6 = inlined_call_operand.<no memory space> [shape: f32[1,1], index: 6, kind: input, shape index: {}]   ;;  %s963_s1 = inlined_call_operand.vmem [shape: f32[32,16], index: 1, kind: input, shape index: {}]   ;;  %s964_s2 = inlined_call_operand.vmem [shape: f32[32,1], index: 2, kind: input, shape index: {}]   ;;  %s965_s4 = inlined_call_operand.vmem [shape: f32[64,1], index: 4, kind: input, shape index: {}]   ;;  %s966_s3 = inlined_call_operand.vmem [shape: f32[64,32], index: 3, kind: input, shape index: {}]   ;;  %s967_s5 = inlined_call_operand.vmem [shape: f32[1,64], index: 5, kind: input, shape index: {}]   ;;  %s968_s7 = inlined_call_operand.vmem [shape: f32[1,128], index: 7, kind: output, shape index: {}]  }
   0x1   :  { %v28_v0 = vld [vmem:[%s961_s0] sm:$0xff]  ;;  %v29_v1 = vld [vmem:[%s961_s0 + $0x8] sm:$0xff]  ;;  %vm790_vm1 = vmpackc.low %vm72_vm0, %vm72_vm0  ;;  %732 = vset.pattern.permute.xlu0 %v738_v3  ;;  %733 = vset.pattern.permute.xlu1 %v738_v3  ;;  %v12_v4 = vstv %s962_s6  ;;  %vm427_vm4 = vcmask 523264  }
   0x2   :  { %v660_v5 = vpack.c.bf16 %v29_v1, %v28_v0  ;;  %v30_v6 = vld [vmem:[%s961_s0 + $0x10] sm:$0xff]  ;;  %v31_v7 = vld [vmem:[%s961_s0 + $0x18] sm:$0xff]  ;;  %13 = vst [vmem:[#allocation2] sm:$0x1] %v12_v4  ;;  %v44_v9 = vld [vmem:[%s963_s1] sm:$0xff] }
   0x3   :  { %v666_v8 = vpack.c.bf16 %v31_v7, %v30_v6  ;;  %v32_v10 = vld [vmem:[%s961_s0 + $0x20] sm:$0xff]  ;;  %v33_v11 = vld [vmem:[%s961_s0 + $0x28] sm:$0xff]  ;;  %615 = vmatprep.mubr.msk.f32.mxu0 %vm72_vm0, %v44_v9  ;;  %v50_v13 = vld [vmem:[%s964_s2 + $0x10] sm:$0xff]  ;;  %v739_v6 = vmov 0.0|0.0   ;;  %v741_v7 = vmov 0.0  }
   0x4   :  { %662 = vmatprep.subr.msk.bf16.mxu0 %vm790_vm1, %v660_v5  ;;  %v48_v12 = vld [vmem:[%s964_s2] sm:$0xff]  ;;  %64 = vperm.xlu1 %733, %v50_v13   ;;  %v672_v14 = vpack.c.bf16 %v33_v11, %v32_v10  ;;  %v49_v15 = vld [vmem:[%s964_s2 + $0x8] sm:$0xff]  ;;  %v51_v16 = vld [vmem:[%s964_s2 + $0x18] sm:$0xff] }
   0x5   :  { %665 = vmatpush3.bf16.xpose.msk.msra.mxu0 %vm790_vm1, %v660_v5  ;;  %54 = vperm.xlu0 %732, %v48_v12   ;;  %v230_v17 = vld [vmem:[%s965_s4] sm:$0xff]  ;;  %v34_v18 = vld [vmem:[%s961_s0 + $0x30] sm:$0xff]  ;;  %v35_v19 = vld [vmem:[%s961_s0 + $0x38] sm:$0xff] }
   0x6   :  { %668 = vmatprep.subr.msk.bf16.mxu0 %vm790_vm1, %v666_v8  ;;  %v231_v20 = vld [vmem:[%s965_s4 + $0x8] sm:$0xff]  ;;  %v678_v21 = vpack.c.bf16 %v35_v19, %v34_v18  ;;  %v232_v22 = vld [vmem:[%s965_s4 + $0x10] sm:$0xff]  ;;  %v233_v23 = vld [vmem:[%s965_s4 + $0x18] sm:$0xff] }
   0x7   :  { %v234_v24 = vld [vmem:[%s965_s4 + $0x20] sm:$0xff]  ;;  %v37_v26 = vld [vmem:[%s961_s0 + $0x48] sm:$0xff]  ;;  %v236_v29 = vld [vmem:[%s965_s4 + $0x30] sm:$0xff] }
   0x8   :  { %69 = vperm.xlu1 %733, %v51_v16   ;;  %v36_v25 = vld [vmem:[%s961_s0 + $0x40] sm:$0xff]  ;;  %v235_v27 = vld [vmem:[%s965_s4 + $0x28] sm:$0xff]  ;;  %v237_v30 = vld [vmem:[%s965_s4 + $0x38] sm:$0xff] }
   0x9   :  { %59 = vperm.xlu0 %732, %v49_v15   ;;  %v684_v28 = vpack.c.bf16 %v37_v26, %v36_v25  ;;  %v417_v31 = vld [vmem:[#allocation2] sm:$0x1]  ;;  %v38_v32 = vld [vmem:[%s961_s0 + $0x50] sm:$0xff]  ;;  %v39_v33 = vld [vmem:[%s961_s0 + $0x58] sm:$0xff] }
   0xa   :  { %v690_v34 = vpack.c.bf16 %v39_v33, %v38_v32  ;;  %v40_v35 = vld [vmem:[%s961_s0 + $0x60] sm:$0xff]  ;;  %v41_v36 = vld [vmem:[%s961_s0 + $0x68] sm:$0xff]  ;;  %v42_v38 = vld [vmem:[%s961_s0 + $0x70] sm:$0xff] }
   0xb   :  { %v696_v37 = vpack.c.bf16 %v41_v36, %v40_v35  ;;  %v43_v39 = vld [vmem:[%s961_s0 + $0x78] sm:$0xff]  ;;  %v45_v41 = vld [vmem:[%s963_s1 + $0x8] sm:$0xff]  ;;  %v46_v42 = vld [vmem:[%s963_s1 + $0x10] sm:$0xff] }
   0xc   :  { %245 = vperm.xlu1 %733, %v231_v20   ;;  %v702_v40 = vpack.c.bf16 %v43_v39, %v42_v38  ;;  %v47_v43 = vld [vmem:[%s963_s1 + $0x18] sm:$0xff]  ;;  %v222_v44 = vld [vmem:[%s966_s3] sm:$0xff]  ;;  %v223_v63 = vld [vmem:[%s966_s3 + $0x8] sm:$0xff] }
   0xd   :  { %671 = vmatpush3.bf16.xpose.msk.msra.mxu0 %vm790_vm1, %v666_v8  ;;  %240 = vperm.xlu0 %732, %v230_v17   ;;  %v224_v0 = vld [vmem:[%s966_s3 + $0x10] sm:$0xff]  ;;  %v225_v1 = vld [vmem:[%s966_s3 + $0x18] sm:$0xff]  ;;  %v226_v2 = vld [vmem:[%s966_s3 + $0x20] sm:$0xff] }
   0xe   :  { %674 = vmatprep.subr.msk.bf16.mxu0 %vm790_vm1, %v672_v14  ;;  %629 = vmatprep.mubr.msk.f32.mxu1 %vm278_vm2, %v222_v44  ;;  %v227_v3 = vld [vmem:[%s966_s3 + $0x28] sm:$0xff]  ;;  %v228_v4 = vld [vmem:[%s966_s3 + $0x30] sm:$0xff]  ;;  %v229_v5 = vld [vmem:[%s966_s3 + $0x38] sm:$0xff] }
   0xf   :  { %v416_v44 = vld [vmem:[%s967_s5] sm:$0x1] }
  0x10   :  { %255 = vperm.xlu1 %733, %v233_v23  }
  0x11   :  { %250 = vperm.xlu0 %732, %v232_v22  }
  0x14   :  { %265 = vperm.xlu1 %733, %v235_v27  }
  0x15   :  { %677 = vmatpush3.bf16.xpose.msk.msra.mxu0 %vm790_vm1, %v672_v14  ;;  %260 = vperm.xlu0 %732, %v234_v24  }
  0x16   :  { %680 = vmatprep.subr.msk.bf16.mxu0 %vm790_vm1, %v678_v21 }
  0x18   :  { %275 = vperm.xlu1 %733, %v237_v30  }
  0x19   :  { %270 = vperm.xlu0 %732, %v236_v29  }
  0x1d   :  { %683 = vmatpush3.bf16.xpose.msk.msra.mxu0 %vm790_vm1, %v678_v21  ;;  %420 = vperm.xlu0 %732, %v417_v31  }
  0x1e   :  { %686 = vmatprep.subr.msk.bf16.mxu0 %vm790_vm1, %v684_v28 }
  0x25   :  { %689 = vmatpush3.bf16.xpose.msk.msra.mxu0 %vm790_vm1, %v684_v28 }
  0x26   :  { %692 = vmatprep.subr.msk.bf16.mxu0 %vm790_vm1, %v690_v34 }
  0x2d   :  { %695 = vmatpush3.bf16.xpose.msk.msra.mxu0 %vm790_vm1, %v690_v34 }
  0x2e   :  { %698 = vmatprep.subr.msk.bf16.mxu0 %vm790_vm1, %v696_v37 }
  0x35   :  { %701 = vmatpush3.bf16.xpose.msk.msra.mxu0 %vm790_vm1, %v696_v37 }
  0x36   :  { %704 = vmatprep.subr.msk.bf16.mxu0 %vm790_vm1, %v702_v40 }
  0x3d   :  { %707 = vmatpush3.bf16.xpose.msk.msra.mxu0 %vm790_vm1, %v702_v40 }
  0x44   :  { %616 = vmatmul.mubr.msk.f32.vlgmr.msra.gmra.mrb[0].mxu0 %vm72_vm0, %v45_v41 }
  0x45   :  { %618 = vmatprep.mubr.msk.f32.mxu0 %vm72_vm0, %v46_v42 }
  0x48   :  { %619 = vmatmul.mubr.msk.f32.gmra.mrb[2].mxu0 %vm72_vm0, %v47_v43 }
  0x83   :  { %v65_v46 = vpop.permute.xlu1 %64 }
  0x84   :  { %v55_v45 = vpop.permute.xlu0 %54 }
  0x87   :  { %v70_v53 = vpop.permute.xlu1 %69 }
  0x88   :  { %v60_v47 = vpop.permute.xlu0 %59 }
  0x8b   :  { %v246_v8 = vpop.permute.xlu1 %245 }
  0x8c   :  { %v241_v9 = vpop.permute.xlu0 %240 }
  0x8f   :  { %v256_v10 = vpop.permute.xlu1 %255 }
  0x90   :  { %v251_v12 = vpop.permute.xlu0 %250 }
  0x93   :  { %v266_v21 = vpop.permute.xlu1 %265 }
  0x94   :  { %v261_v24 = vpop.permute.xlu0 %260 }
  0x97   :  { %v276_v33 = vpop.permute.xlu1 %275 }
  0x98   :  { %v271_v36 = vpop.permute.xlu0 %270 }
 0x117   :  { %v617_v48 = vpop.f32.mrb[0].mxu0 }
 0x118   :  { %v205_v49 = vadd.f32 %v617_v48, %v60_v47  ;;  %v199_v50 = vpop.f32.mrb[1].mxu0  ;;  %v421_v48 = vpop.permute.xlu0 %420 }
 0x119   :  { %v200_v51 = vadd.f32 %v199_v50, %v55_v45  ;;  %v423_v45 = vlaneseq }
 0x11a   :  { %v219_v52 = vmax.f32 %v205_v49, 0.0 }
 0x11b   :  { %v218_v54 = vmax.f32 %v200_v51, 0.0  ;;  %v620_v55 = vpop.f32.mrb[2].mxu0 }
 0x11c   :  { %v215_v56 = vadd.f32 %v620_v55, %v70_v53  ;;  %v209_v57 = vpop.f32.mrb[3].mxu0 }
 0x11d   :  { %v210_v58 = vadd.f32 %v209_v57, %v65_v46  ;;  %v708_v59 = vpack.c.bf16 %v219_v52, %v218_v54  ;;  %v424_v46 = vshrl.u32 %v423_v45, 7 }
 0x11e   :  { %v221_v60 = vmax.f32 %v215_v56, 0.0 }
 0x11f   :  { %v220_v61 = vmax.f32 %v210_v58, 0.0  ;;  %709 = vmatprep.subr.bf16.mxu1 %v708_v59  ;;  %v425_v47 = vsub.s32 0, %v424_v46 }
 0x120   :  { %711 = vmatpush3.bf16.msra.mxu1 %v708_v59 }
 0x121   :  { %v712_v62 = vpack.c.bf16 %v221_v60, %v220_v61  ;;  %v426_v49 = vrot.slane %v421_v48, %v425_v47 }
 0x123   :  { %713 = vmatprep.subr.bf16.mxu1 %v712_v62 }
 0x124   :  { %715 = vmatpush3.bf16.msra.mxu1 %v712_v62 }
 0x125   :  { %716 = vmatprep.subr.bf16.mxu1 %v739_v6 }
 0x127   :  { %630 = vmatmul.mubr.msk.f32.vlgmr.msra.gmra.mrb[0].mxu1 %vm278_vm2, %v223_v63 }
 0x128   :  { %632 = vmatprep.mubr.msk.f32.mxu1 %vm278_vm2, %v224_v0 }
 0x12b   :  { %633 = vmatmul.mubr.msk.f32.gmra.mrb[2].mxu1 %vm278_vm2, %v225_v1 }
 0x12c   :  { %635 = vmatprep.mubr.msk.f32.mxu1 %vm278_vm2, %v226_v2 }
 0x12f   :  { %636 = vmatmul.mubr.msk.f32.gmra.mrb[4].mxu1 %vm278_vm2, %v227_v3 }
 0x130   :  { %638 = vmatprep.mubr.msk.f32.mxu1 %vm278_vm2, %v228_v4 }
 0x133   :  { %639 = vmatmul.mubr.msk.f32.gmra.mrb[6].mxu1 %vm278_vm2, %v229_v5 }
 0x134   :  { %657 = vmatprep.mubr.msk.f32.mxu1 %vm740_vm3, %v741_v7 }
 0x1fa   :  { %v631_v11 = vpop.f32.mrb[0].mxu1 }
 0x1fb   :  { %v375_v13 = vadd.f32 %v631_v11, %v246_v8  ;;  %v369_v14 = vpop.f32.mrb[1].mxu1 }
 0x1fc   :  { %v370_v15 = vadd.f32 %v369_v14, %v241_v9 }
 0x1fd   :  { %v409_v16 = vmax.f32 %v375_v13, 0.0 }
 0x1fe   :  { %v408_v17 = vmax.f32 %v370_v15, 0.0  ;;  %v634_v18 = vpop.f32.mrb[2].mxu1 }
 0x1ff   :  { %v385_v19 = vadd.f32 %v634_v18, %v256_v10  ;;  %v379_v20 = vpop.f32.mrb[3].mxu1 }
 0x200   :  { %v717_v22 = vpack.c.bf16 %v409_v16, %v408_v17  ;;  %v380_v23 = vadd.f32 %v379_v20, %v251_v12 }
 0x201   :  { %v411_v25 = vmax.f32 %v385_v19, 0.0 }
 0x202   :  { %v410_v26 = vmax.f32 %v380_v23, 0.0  ;;  %v637_v27 = vpop.f32.mrb[4].mxu1  ;;  %718 = vmatpush3.bf16.msra.mxu1 %v717_v22 }
 0x203   :  { %v395_v28 = vadd.f32 %v637_v27, %v266_v21  ;;  %v389_v29 = vpop.f32.mrb[5].mxu1  ;;  %719 = vmatprep.subr.bf16.mxu1 %v739_v6 }
 0x204   :  { %v720_v30 = vpack.c.bf16 %v411_v25, %v410_v26  ;;  %v390_v31 = vadd.f32 %v389_v29, %v261_v24 }
 0x205   :  { %v413_v32 = vmax.f32 %v395_v28, 0.0 }
 0x206   :  { %v412_v34 = vmax.f32 %v390_v31, 0.0  ;;  %v640_v35 = vpop.f32.mrb[6].mxu1  ;;  %721 = vmatpush3.bf16.msra.mxu1 %v720_v30 }
 0x207   :  { %v405_v37 = vadd.f32 %v640_v35, %v276_v33  ;;  %v399_v38 = vpop.f32.mrb[7].mxu1  ;;  %722 = vmatprep.subr.bf16.mxu1 %v739_v6 }
 0x208   :  { %v723_v39 = vpack.c.bf16 %v413_v32, %v412_v34  ;;  %v400_v40 = vadd.f32 %v399_v38, %v271_v36 }
 0x209   :  { %v415_v41 = vmax.f32 %v405_v37, 0.0 }
 0x20a   :  { %v414_v42 = vmax.f32 %v400_v40, 0.0  ;;  %724 = vmatpush3.bf16.msra.mxu1 %v723_v39 }
 0x20b   :  { %725 = vmatprep.subr.bf16.mxu1 %v739_v6 }
 0x20c   :  { %v726_v43 = vpack.c.bf16 %v415_v41, %v414_v42 }
 0x20e   :  { %727 = vmatpush3.bf16.msra.mxu1 %v726_v43 }
 0x211   :  { %658 = vmatmul.mubr.msk.f32.vlgmr.msra.gmra.mrb[8].mxu1 %vm427_vm4, %v416_v44 }
 0x2e4   :  { %v497_v50 = vpop.f32.mrb[8].mxu1 }
 0x2e5   :  { %v498_v51 = vadd.f32 %v497_v50, %v426_v49  ;;  %v659_v52 = vpop.f32.mrb[9].mxu1 }
 0x2e7   :  { %v541_v53 = vmul.f32 -1.442695, %v498_v51 }
 0x2e9   :  { %734 = vpow2.f32 %v541_v53 }
 0x2f3   :  { %v735_v54 = vpop.eup %734 }
 0x2f4   :  { %v504_v55 = vadd.f32 1.0, %v735_v54 }
 0x2f6   :  { %736 = vrcp.f32 %v504_v55 }
 0x300   :  { %v737_v56 = vpop.eup %736 }
 0x301   :  { %507 = vst [vmem:[%s968_s7] sm:$0x1] %v737_v56 }

</bundles_post_ra>
